<compile_context>
chip_gen: v5e
topology: v5e:2x2
jax: 0.10.0
libtpu: 0.0.40
codegen_flags: <defaults>
</compile_context>

<pallas_src>
import math

import jax
import jax.numpy as jnp
from jax.experimental import pallas as pl
from jax.experimental.pallas import tpu as pltpu


# ----------------------------------------------------------------------------
# Pallas kernel: lane-dense per-channel scale  o = x * gamma_row
# ----------------------------------------------------------------------------
def _layer_scale_kernel(x_ref, g_ref, o_ref):
    # x_ref: (block_rows, LW)  flattened activations, LW % 128 == 0
    # g_ref: (1, LW)           gamma tiled LW // dim times
    # o_ref: (block_rows, LW)
    o_ref[...] = x_ref[...] * g_ref[...]


def _vmem_capacity_bytes():
    try:
        return int(pltpu.get_tpu_info().vmem_capacity_bytes)
    except Exception:
        return 64 * 1024 * 1024  # conservative fallback (v7x physical VMEM)


def _choose_block_rows(rows, lw, itemsize):
    """Generation-aware row-block size for the (rows, lw) slab."""
    vmem_cap = _vmem_capacity_bytes()
    # Pipeline holds ~2 buffers each for input and output (~4x block bytes);
    # keep that comfortably inside the scoped limit we request below while
    # still giving multi-MiB DMAs (per-step overhead <10% of DMA time).
    target_block_bytes = max(1 << 20, min(8 << 20, vmem_cap // 12))
    row_bytes = lw * itemsize
    block_rows = max(8, (target_block_bytes // row_bytes) // 8 * 8)

    if block_rows >= rows:
        if rows <= 8:
            # Single block equal to the full array extent (allowed by the
            # (8,128) rule even when rows % 8 != 0).
            block_rows = rows
        else:
            # Guarantee >= 2 grid steps so the "parallel" axis can shard
            # across both TensorCores on megacore parts (v7x).
            block_rows = ((pl.cdiv(rows, 2) + 7) // 8) * 8
    return block_rows, vmem_cap


def _scale_slab(x2, g_row):
    """gamma-row scale of a lane-dense (rows, LW) slab via pallas_call."""
    rows, lw = x2.shape
    block_rows, vmem_cap = _choose_block_rows(rows, lw, x2.dtype.itemsize)
    num_blocks = pl.cdiv(rows, block_rows)
    # Leave headroom under physical VMEM (64 MiB on v7x, 128 MiB on v5e/v6e).
    vmem_limit = int(min(3 * vmem_cap // 4, 96 << 20))

    return pl.pallas_call(
        _layer_scale_kernel,
        out_shape=jax.ShapeDtypeStruct((rows, lw), x2.dtype),
        grid_spec=pltpu.PrefetchScalarGridSpec(
            num_scalar_prefetch=0,
            grid=(num_blocks,),
            in_specs=[
                pl.BlockSpec((block_rows, lw), lambda i: (i, 0)),
                pl.BlockSpec((1, lw), lambda i: (0, 0)),
            ],
            out_specs=pl.BlockSpec((block_rows, lw), lambda i: (i, 0)),
        ),
        compiler_params=pltpu.CompilerParams(
            dimension_semantics=("parallel",),
            vmem_limit_bytes=vmem_limit),
    )(x2, g_row)


def _layer_scale_pallas(x, gamma):
    """Computes gamma * x with gamma of shape (dim,) broadcast on the last axis."""
    dim = gamma.shape[-1]
    assert x.shape[-1] == dim, (x.shape, gamma.shape)
    orig_shape = x.shape
    total = x.size

    # Lane-dense width: a multiple of both `dim` (tiled gamma row stays
    # channel-aligned) and 128 (unmasked, full-lane stores).
    lw = (dim * 128) // math.gcd(dim, 128)  # lcm(dim, 128)
    g = lw // dim
    # NOTE: gamma is cast to x.dtype; PyTorch would promote bf16*f32 -> f32.
    gamma_x = gamma.astype(x.dtype)
    g_row = jnp.tile(gamma_x, g).reshape(1, lw)

    if total % lw == 0:
        # Fast path: whole tensor re-viewed (free reshape) as a lane-dense slab.
        out = _scale_slab(x.reshape(total // lw, lw), g_row)
        return out.reshape(orig_shape)

    # Ragged total: keep the >=128-lane slab for the bulk, handle the tiny
    # (< lw element) tail in plain JAX.
    n = total // dim
    n_main = (n // g) * g
    x_rows = x.reshape(n, dim)
    tail = x_rows[n_main:] * gamma_x
    if n_main == 0:
        out = tail
    else:
        main = _scale_slab(x_rows[:n_main].reshape(n_main // g, lw), g_row)
        out = jnp.concatenate([main.reshape(n_main, dim), tail], axis=0)
    return out.reshape(orig_shape)


# ----------------------------------------------------------------------------
# LayerScaleModule forward
# ----------------------------------------------------------------------------
def layer_scale_module_forward(module_fn, gamma, *args, **kwargs):
    """Equivalent of LayerScaleModule.forward.

    module_fn : JAX callable standing in for the wrapped nn.Module.
    gamma     : (dim,) LayerScale parameter, or None when init_value <= 0.0
                (the PyTorch module then uses nn.Identity).
    """
    y = module_fn(*args, **kwargs)
    if gamma is None:
        return y
    return _layer_scale_pallas(y, gamma)


# ----------------------------------------------------------------------------
# Demo / correctness checks
# ----------------------------------------------------------------------------
if __name__ == "__main__":
    key = jax.random.PRNGKey(0)
    kx, kw, kb, kx2, kx3 = jax.random.split(key, 5)

    # Small shapes: batch=2, seq=8, hidden(dim)=32.
    B, S, D = 2, 8, 32
    init_value = 0.1

    x = jax.random.normal(kx, (B, S, D), jnp.float32)

    # Example wrapped module: a simple linear projection (deterministic params).
    W = 0.1 * jax.random.normal(kw, (D, D), jnp.float32)
    b = 0.1 * jax.random.normal(kb, (D,), jnp.float32)

    def wrapped_module(t):
        return jnp.dot(t, W) + b

    # LayerScale parameter: init_value * ones(dim), perturbed per-channel so the
    # broadcast direction is actually tested.
    gamma = init_value * jnp.ones((D,), jnp.float32) \
        + 0.01 * jnp.arange(D, dtype=jnp.float32)

    fwd = jax.jit(lambda t: layer_scale_module_forward(wrapped_module, gamma, t))
    out = jax.block_until_ready(fwd(x))

    module_out = wrapped_module(x)
    ref = gamma * module_out
    assert out.shape == (B, S, D), out.shape
    assert jnp.allclose(out, ref, atol=1e-6, rtol=1e-6), (
        float(jnp.max(jnp.abs(out - ref))))

    # init_value <= 0.0 path: layer_scale is nn.Identity -> output == module(x).
    out_id = jax.block_until_ready(
        jax.jit(lambda t: layer_scale_module_forward(wrapped_module, None, t))(x))
    assert jnp.allclose(out_id, module_out, atol=1e-6, rtol=1e-6)

    # Partial boundary block + >=2 grid steps path (rows=12, block=8 -> 8 + 4).
    x_b = jax.random.normal(kx2, (2, 24, D), jnp.float32)
    out_b = jax.block_until_ready(
        jax.jit(lambda t: _layer_scale_pallas(t, gamma))(x_b))
    assert jnp.allclose(out_b, gamma * x_b, atol=1e-6, rtol=1e-6)

    # Ragged-total fallback path (total % lcm(dim,128) != 0).
    x_c = jax.random.normal(kx3, (3, 5, D), jnp.float32)
    out_c = jax.block_until_ready(
        jax.jit(lambda t: _layer_scale_pallas(t, gamma))(x_c))
    assert jnp.allclose(out_c, gamma * x_c, atol=1e-6, rtol=1e-6)

    print("KERNEL_OK")
</pallas_src>

<mosaic_0001>
module attributes {stable_mosaic.version = 11 : i64} {
  func.func @_layer_scale_kernel(%arg0: i32, %arg1: memref<4x128xf32, #tpu.memory_space<vmem>>, %arg2: memref<1x128xf32, #tpu.memory_space<vmem>>, %arg3: memref<4x128xf32, #tpu.memory_space<vmem>>) attributes {dimension_semantics = [#tpu.dimension_semantics<parallel>], iteration_bounds = array<i64: 1>, scalar_prefetch = 0 : i64, scratch_operands = 0 : i64, tpu.core_type = #tpu.core_type<tc>, window_params = [{transform_indices = @transform_0, window_bounds = array<i64: 4, 128>}, {pipeline_mode = #tpu.pipeline_mode<synchronous>, transform_indices = @transform_1, window_bounds = array<i64: 1, 128>}, {transform_indices = @transform_2, window_bounds = array<i64: 4, 128>}]} {
    %c0 = arith.constant 0 : index
    %c0_0 = arith.constant 0 : index
    %0 = vector.load %arg1[%c0, %c0_0] : memref<4x128xf32, #tpu.memory_space<vmem>>, vector<4x128xf32>
    %c0_1 = arith.constant 0 : index
    %c0_2 = arith.constant 0 : index
    %1 = vector.load %arg2[%c0_1, %c0_2] : memref<1x128xf32, #tpu.memory_space<vmem>>, vector<1x128xf32>
    %2 = vector.broadcast %1 : vector<1x128xf32> to vector<4x128xf32>
    %3 = arith.mulf %0, %2 : vector<4x128xf32>
    %c0_3 = arith.constant 0 : index
    %c0_4 = arith.constant 0 : index
    %4 = vector.load %arg3[%c0_3, %c0_4] : memref<4x128xf32, #tpu.memory_space<vmem>>, vector<4x128xf32>
    tpu.vector_store %arg3[%c0_3, %c0_4], %3 {strides = array<i32>} : memref<4x128xf32, #tpu.memory_space<vmem>>, vector<4x128xf32>,
    return
  }
  func.func @transform_0(%arg0: i32) -> (i32, i32) {
    %c0_i32 = arith.constant 0 : i32
    %c0_i32_0 = arith.constant 0 : i32
    return %arg0, %c0_i32 : i32, i32
  }
  func.func @transform_1(%arg0: i32) -> (i32, i32) {
    %c0_i32 = arith.constant 0 : i32
    %c0_i32_0 = arith.constant 0 : i32
    %c0_i32_1 = arith.constant 0 : i32
    return %c0_i32, %c0_i32_0 : i32, i32
  }
  func.func @transform_2(%arg0: i32) -> (i32, i32) {
    %c0_i32 = arith.constant 0 : i32
    %c0_i32_0 = arith.constant 0 : i32
    return %arg0, %c0_i32 : i32, i32
  }
}

</mosaic_0001>

<bundles_post_ra>
// kernel: tile.7
= control target key start
LH: loop header
LB: loop body
LE: loop exit
PB: predicated region body
PF: predicated region fallthrough
CT: control target
= control target key end

     0   :  { %s37_s8 = smov 32   ;;  %s38_s9 = smov 64   ;;  %vm7_vm0 = vcmask 261120   ;;  %vm13_vm1 = vcmask 1048320   ;;  %vm19_vm2 = vcmask 785920   ;;  %vm25_vm3 = vcmask 523520   ;;  %s55_s0 = inlined_call_operand.vmem [shape: f32[4,32], index: 0, kind: input, shape index: {}]   ;;  %s56_s1 = inlined_call_operand.vmem [shape: f32[1,128], index: 1, kind: output, shape index: {}]  }
   0x1   :  { %v4_v0 = vld [vmem:[%s55_s0] sm:$0xf]  ;;  %s36_s0 = smov 96  }
   0x2   :  { %5 = vst [vmem:[#allocation1] sm:$0xf] %v4_v0 }
   0x9   :  { %v10_v1 = vld [vmem:[#allocation1 + $0x3] sm:$0x1]   ;;  %v22_v2 = vld [vmem:[#allocation1 + $0x1] sm:$0x1]   ;;  %v16_v3 = vld [vmem:[#allocation1 + $0x2] sm:$0x1]  }
   0xa   :  { %11 = vrot.lane.b32.xlu0 %v10_v1, %s36_s0  ;;  %23 = vrot.lane.b32.xlu1 %v22_v2, %s37_s8  ;;  %v6_v4 = vld [vmem:[#allocation1] sm:$0x1]  }
   0xb   :  { %8 = vst.msk [vmem:[#allocation0] sm:$0x1] %vm7_vm0, %v6_v4  }
  0x12   :  { %17 = vrot.lane.b32.xlu0 %v16_v3, %s38_s9 }
  0x7c   :  { %v12_v5 = vpop.permute.xlu0 %11   ;;  %v24_v6 = vpop.permute.xlu1 %23  }
  0x7d   :  { %14 = vst.msk [vmem:[#allocation0] sm:$0x1] %vm13_vm1, %v12_v5  }
  0x84   :  { %v18_v7 = vpop.permute.xlu0 %17  }
  0x85   :  { %20 = vst.msk [vmem:[#allocation0] sm:$0x1] %vm19_vm2, %v18_v7  }
  0x86   :  { %26 = vst.msk [vmem:[#allocation0] sm:$0x1] %vm25_vm3, %v24_v6  }
  0x8d   :  { %v29_v8 = vld [vmem:[#allocation0] sm:$0x1] }
  0x8e   :  { %32 = vst [vmem:[%s56_s1] sm:$0x1] %v29_v8 }

// kernel: tile.6
= control target key start
LH: loop header
LB: loop body
LE: loop exit
PB: predicated region body
PF: predicated region fallthrough
CT: control target
= control target key end

     0   :  { %s22_s0 = inlined_call_operand.vmem [shape: f32[32], index: 0, kind: input, shape index: {}]   ;;  %s23_s1 = inlined_call_operand.vmem [shape: f32[4,32], index: 1, kind: output, shape index: {}]  }
   0x1   :  { %v4_v0 = vld [vmem:[%s22_s0] ss:$0 sm:$0xff] }
   0x2   :  { %5 = vst [vmem:[%s23_s1] sm:$0xf] %v4_v0 }

// kernel: _lambda_.1
= control target key start
LH: loop header
LB: loop body
LE: loop exit
PB: predicated region body
PF: predicated region fallthrough
CT: control target
= control target key end

     0   :  { %s47_s0 = inlined_call_operand.vmem [shape: f32[4,128], index: 0, kind: input, shape index: {}]   ;;  %s48_s1 = inlined_call_operand.vmem [shape: f32[1,128], index: 1, kind: input, shape index: {}]   ;;  %s49_s2 = inlined_call_operand.vmem [shape: f32[4,128], index: 2, kind: output, shape index: {}]  }
   0x1   :  { %v11_v0 = vld [vmem:[%s47_s0] sm:$0xf] }
   0x2   :  { %v22_v1 = vld [vmem:[%s48_s1] ss:$0 sm:$0xff] }
   0x3   :  { %v16_v2 = vmul.f32 %v22_v1, %v11_v0 }
   0x5   :  { %17 = vst [vmem:[%s49_s2] sm:$0xf] %v16_v2 }

</bundles_post_ra>
